<compile_context>
chip_gen: v7x
topology: tpu7x:2x2x1
jax: 0.10.0
libtpu: 0.0.40
codegen_flags: <defaults>
</compile_context>

<pallas_src>
import functools

import numpy as np
import jax
import jax.numpy as jnp
from jax.experimental import pallas as pl
from jax.experimental.pallas import tpu as pltpu


# ----------------------------------------------------------------------------
# small helpers (all static Python on shapes)
# ----------------------------------------------------------------------------
def _round_up(x, m):
    return ((x + m - 1) // m) * m


def _cdiv(a, b):
    return -(-a // b)


def _pick_tile(dim, base, max_tile):
    """Pad `dim` up to a multiple of `base`, pick a tile <= max_tile that divides
    the padded size exactly. Returns (padded_dim, tile)."""
    dp = _round_up(dim, base)
    if dp <= max_tile:
        return dp, dp
    n = _cdiv(dp, max_tile)
    t = _round_up(_cdiv(dp, n), base)
    return n * t, t


# ----------------------------------------------------------------------------
# Pallas kernels
# ----------------------------------------------------------------------------
def masked_weight_kernel(w1t_ref, m1t_ref, w2t_ref, m2t_ref, out_ref):
    """masked_w^T = (lr_w1*mask1)^T [Kin_p,R] @ (lr_w2*mask2)^T [R,OC_p] -> bf16."""
    a = w1t_ref[...] * m1t_ref[...]                 # (Kin_p, R) f32
    b = w2t_ref[...] * m2t_ref[...]                 # (R, OC_p) f32
    wt = jax.lax.dot_general(
        a, b, (((1,), (0,)), ((), ())),
        preferred_element_type=jnp.float32,
        precision=jax.lax.Precision.HIGHEST)        # tiny: keep f32 accuracy
    out_ref[...] = wt.astype(out_ref.dtype)


def conv_matmul_kernel(p_ref, w_ref, b_ref, o_ref, acc_ref):
    """acc[tm,tn] += patches[tm,tk](bf16) @ masked_w_T[tk,tn](bf16); finalize +bias."""
    @pl.when(pl.program_id(2) == 0)
    def _():
        acc_ref[...] = jnp.zeros_like(acc_ref)

    acc_ref[...] += jax.lax.dot_general(
        p_ref[...], w_ref[...], (((1,), (0,)), ((), ())),
        preferred_element_type=jnp.float32)         # native bf16 MXU path

    @pl.when(pl.program_id(2) == pl.num_programs(2) - 1)
    def _():
        o_ref[...] = (acc_ref[...] + b_ref[...]).astype(o_ref.dtype)


def _pallas_masked_weight(w1_t, m1_t, w2_t, m2_t):
    Kin_p, R = w1_t.shape
    OC_p = w2_t.shape[1]
    return pl.pallas_call(
        masked_weight_kernel,
        out_shape=jax.ShapeDtypeStruct((Kin_p, OC_p), jnp.bfloat16),
        grid=(1,),
        in_specs=[
            pl.BlockSpec((Kin_p, R), lambda i: (0, 0)),
            pl.BlockSpec((Kin_p, R), lambda i: (0, 0)),
            pl.BlockSpec((R, OC_p), lambda i: (0, 0)),
            pl.BlockSpec((R, OC_p), lambda i: (0, 0)),
        ],
        out_specs=pl.BlockSpec((Kin_p, OC_p), lambda i: (0, 0)),
    )(w1_t, m1_t, w2_t, m2_t)


def _pallas_conv_matmul(patches, w_t, bias2d, tm, tn, tk):
    """patches (Mp,Kin_p) bf16, w_t (Kin_p,OC_p) bf16, bias2d (1,OC_p) f32."""
    Mp, Kin_p = patches.shape
    OC_p = w_t.shape[1]
    n_i, n_j, n_k = Mp // tm, OC_p // tn, Kin_p // tk
    bytes_accessed = (Mp * Kin_p * 2 * n_j          # patches re-read per OC tile
                      + Kin_p * OC_p * 2 * n_i      # weight re-read per M tile
                      + Mp * OC_p * 4)
    return pl.pallas_call(
        conv_matmul_kernel,
        out_shape=jax.ShapeDtypeStruct((Mp, OC_p), jnp.float32),
        grid_spec=pltpu.PrefetchScalarGridSpec(
            num_scalar_prefetch=0,
            grid=(n_i, n_j, n_k),
            in_specs=[
                pl.BlockSpec((tm, tk), lambda i, j, k: (i, k)),
                pl.BlockSpec((tk, tn), lambda i, j, k: (k, j)),
                pl.BlockSpec((1, tn), lambda i, j, k: (0, j)),
            ],
            out_specs=pl.BlockSpec((tm, tn), lambda i, j, k: (i, j)),
            scratch_shapes=[pltpu.VMEM((tm, tn), jnp.float32)],
        ),
        compiler_params=pltpu.CompilerParams(
            dimension_semantics=("parallel", "parallel", "arbitrary"),
            vmem_limit_bytes=32 * 1024 * 1024,
        ),
        cost_estimate=pl.CostEstimate(
            flops=2 * Mp * Kin_p * OC_p,
            transcendentals=0,
            bytes_accessed=bytes_accessed),
    )(patches, w_t, bias2d)


# ----------------------------------------------------------------------------
# Gaudi mask generation (JAX glue: needs irfft)
# ----------------------------------------------------------------------------
def gaudi_mask(width_q, loc, n, sigma):
    """Eval-mode GaudiGBLR.get_mask for one axis. Returns (num_components, n)."""
    w = jnp.where(jnp.abs(width_q) <= 1.0 / n, 0.0, width_q)    # hardshrink (eval)
    loc = jnp.round(loc * n) / n                                 # location quantization
    freq = jnp.arange(0.0, n // 2 + 1, 1.0, dtype=jnp.float32)[None, :]
    wv = w[:, None]
    locv = loc[:, None] * 2.0 * jnp.pi
    exponent_imag = -freq * locv + jnp.pi * freq * (1.0 / n - wv)
    exponent_real = -0.5 / (sigma ** 2) * freq ** 2
    exponent = exponent_real + 1j * exponent_imag
    mask = wv * jnp.sinc(freq * wv) / jnp.sinc(freq / n) * jnp.exp(exponent)
    # TODO(synk): irfft has no Pallas TPU primitive; mask generation stays in plain JAX.
    mask = jnp.fft.irfft(mask, n=n, norm='forward')
    mask = jnp.where(jnp.abs(mask) < 1e-3, 0.0, mask)            # eval-mode thresholding
    return mask


# ----------------------------------------------------------------------------
# Patch extraction: one NCHW->NHWC(bf16) relayout + cheap strided slices.
# (No 6-D stack+transpose; column order stays (kh, kw, ic).)
# ----------------------------------------------------------------------------
def _extract_patches(x, kernel_size, stride, padding, dilation, dtype=jnp.bfloat16):
    B, IC, H, W = x.shape
    KH, KW = kernel_size
    SH, SW = stride
    PH, PW = padding
    DH, DW = dilation
    OH = (H + 2 * PH - DH * (KH - 1) - 1) // SH + 1
    OW = (W + 2 * PW - DW * (KW - 1) - 1) // SW + 1
    xh = jnp.transpose(x, (0, 2, 3, 1)).astype(dtype)            # (B,H,W,IC) bf16
    xh = jnp.pad(xh, ((0, 0), (PH, PH), (PW, PW), (0, 0)))
    slabs = []
    for kh in range(KH):
        for kw in range(KW):
            slabs.append(jax.lax.slice(
                xh,
                (0, kh * DH, kw * DW, 0),
                (B, kh * DH + (OH - 1) * SH + 1, kw * DW + (OW - 1) * SW + 1, IC),
                (1, SH, SW, 1)))                                 # (B,OH,OW,IC)
    p = jnp.stack(slabs, axis=3)                                 # (B,OH,OW,KH*KW,IC)
    M = B * OH * OW
    return p.reshape(M, KH * KW * IC), OH, OW, M


# ----------------------------------------------------------------------------
# Full forward of GaudiGBLRConv2dIntegrated (eval mode)
# ----------------------------------------------------------------------------
def gaudi_gblr_conv2d_forward(x, params, *, kernel_size, stride, padding, dilation):
    # TODO(synk): grouped conv (groups > 1) not implemented; this config uses groups=1.
    widths, locations = params['widths'], params['locations']
    lr_w1, lr_w2 = params['lr_weight1'], params['lr_weight2']
    bias, sigma = params['bias'], params['sigma']

    NC, RPC, Kin = lr_w1.shape
    OC = lr_w2.shape[1]
    R = NC * RPC

    # ---- static tiling / padding plan (lane-dense OC, MXU-friendly Kin) ----
    Kin_p, tk = _pick_tile(Kin, 128, 2048)
    OC_p, tn = _pick_tile(OC, 128, 512)
    pad_k, pad_o = Kin_p - Kin, OC_p - OC

    # ---- Gaudi masks (get_width round-quantize is identity-in-value STE) ----
    w_in = jnp.round(widths[0] * Kin) / Kin
    w_out = jnp.round(widths[1] * OC) / OC
    m1 = gaudi_mask(w_in, locations[0], Kin, sigma)              # (NC, Kin)
    m2 = gaudi_mask(w_out, locations[1], OC, sigma)              # (NC, OC)

    # ---- transposed factor layouts so the masked weight comes out as (Kin, OC)
    w1_t = jnp.transpose(lr_w1, (2, 0, 1)).reshape(Kin, R)                         # (Kin, R)
    m1_t = jnp.broadcast_to(m1.T[:, :, None], (Kin, NC, RPC)).reshape(Kin, R)
    w2_t = jnp.transpose(lr_w2, (0, 2, 1)).reshape(R, OC)                          # (R, OC)
    m2_t = jnp.broadcast_to(m2[:, None, :], (NC, RPC, OC)).reshape(R, OC)
    w1_t = jnp.pad(w1_t, ((0, pad_k), (0, 0)))
    m1_t = jnp.pad(m1_t, ((0, pad_k), (0, 0)))
    w2_t = jnp.pad(w2_t, ((0, 0), (0, pad_o)))
    m2_t = jnp.pad(m2_t, ((0, 0), (0, pad_o)))

    masked_w_t = _pallas_masked_weight(w1_t, m1_t, w2_t, m2_t)   # (Kin_p, OC_p) bf16

    # ---- im2col in bf16 and conv-as-matmul ---------------------------------
    patches, OH, OW, M = _extract_patches(x, kernel_size, stride, padding, dilation)
    Mp, tm = _pick_tile(M, 128, 512)
    if Mp != M or pad_k != 0:
        patches = jnp.pad(patches, ((0, Mp - M), (0, pad_k)))

    bias2d = jnp.pad(bias.astype(jnp.float32).reshape(1, OC), ((0, 0), (0, pad_o)))

    out = _pallas_conv_matmul(patches, masked_w_t, bias2d, tm, tn, tk)  # (Mp, OC_p) f32

    B = x.shape[0]
    out = out[:M, :OC].reshape(B, OH, OW, OC)
    return jnp.transpose(out, (0, 3, 1, 2)).astype(x.dtype)             # NCHW


# ----------------------------------------------------------------------------
# Plain-JAX reference (f32, HIGHEST) for verification
# ----------------------------------------------------------------------------
def reference_forward(x, params, *, kernel_size, stride, padding, dilation):
    widths, locations = params['widths'], params['locations']
    lr_w1, lr_w2 = params['lr_weight1'], params['lr_weight2']
    bias, sigma = params['bias'], params['sigma']
    NC, RPC, Kin = lr_w1.shape
    OC = lr_w2.shape[1]
    R = NC * RPC
    KH, KW = kernel_size
    IC = Kin // (KH * KW)

    w_in = jnp.round(widths[0] * Kin) / Kin
    w_out = jnp.round(widths[1] * OC) / OC
    m1 = gaudi_mask(w_in, locations[0], Kin, sigma)[:, None, :]     # (NC,1,Kin)
    m2 = gaudi_mask(w_out, locations[1], OC, sigma)[:, :, None]     # (NC,OC,1)

    w1 = (lr_w1 * m1).reshape(R, Kin)
    w2 = jnp.transpose(lr_w2 * m2, (1, 0, 2)).reshape(OC, R)
    masked_w = jnp.matmul(w2, w1, precision=jax.lax.Precision.HIGHEST)

    weight = masked_w.reshape(OC, KH, KW, IC).transpose(0, 3, 1, 2)  # OIHW
    out = jax.lax.conv_general_dilated(
        x, weight, window_strides=stride,
        padding=[(padding[0], padding[0]), (padding[1], padding[1])],
        rhs_dilation=dilation,
        dimension_numbers=('NCHW', 'OIHW', 'NCHW'),
        precision=jax.lax.Precision.HIGHEST)
    return out + bias[None, :, None, None]


# ----------------------------------------------------------------------------
# Deterministic parameter construction (mirrors __init__ with init='lr',
# width_init='splr', location_init='splr', sigma=100.0)
# ----------------------------------------------------------------------------
def build_params(key, in_channels, out_channels, kernel_size,
                 num_components, rank_per_component):
    KH, KW = kernel_size
    in_f = in_channels * KH * KW
    out_f = out_channels
    NC, RPC = num_components, rank_per_component
    R = NC * RPC

    k_w, k_b, k_loc = jax.random.split(key, 3)
    conv_w = jax.random.normal(k_w, (out_channels, in_channels, KH, KW), jnp.float32) * 0.2
    conv_b = jax.random.normal(k_b, (out_channels,), jnp.float32) * 0.1

    # init='lr': SVD projection of rearrange(W, 'oc ic k1 k2 -> oc (k1 k2 ic)')
    M = np.asarray(jnp.transpose(conv_w, (0, 2, 3, 1)).reshape(out_f, in_f))
    U, S, Vt = np.linalg.svd(M, full_matrices=False)
    s_sqrt = np.sqrt(S[:R])
    U_r = U[:, :R] * s_sqrt[None, :]
    Vt_r = s_sqrt[:, None] * Vt[:R, :]
    lr_w1 = jnp.asarray(Vt_r.reshape(NC, RPC, in_f), jnp.float32)                 # (nc, rpc, in_f)
    lr_w2 = jnp.asarray(np.transpose(U_r.reshape(out_f, NC, RPC), (1, 0, 2)),
                        jnp.float32)                                              # (nc, out_f, rpc)

    # width_init='splr'
    saving = (lr_w1.size + lr_w2.size) / float(in_f * out_f)
    ratio = 1.0 / saving
    num_nonzero = int(NC * ratio * 0.5)
    short = 0.5 * ratio / (1.0 - 0.5 * ratio)
    widths = jnp.concatenate(
        [jnp.ones((2, num_nonzero), jnp.float32),
         jnp.full((2, NC - num_nonzero), short, jnp.float32)], axis=1)
    # location_init='splr' -> uniform(0, 1)
    locations = jax.random.uniform(k_loc, (2, NC), dtype=jnp.float32)

    return dict(widths=widths, locations=locations, lr_weight1=lr_w1,
                lr_weight2=lr_w2, bias=conv_b, sigma=jnp.float32(100.0))


if __name__ == "__main__":
    B, IC, H, W = 2, 4, 16, 16
    OC, KH, KW = 8, 3, 3
    stride, padding, dilation = (1, 1), (1, 1), (1, 1)
    NC, RPC = 4, 2  # num_components, rank_per_component

    key = jax.random.PRNGKey(0)
    k_params, k_x = jax.random.split(key)
    params = build_params(k_params, IC, OC, (KH, KW), NC, RPC)
    x = jax.random.normal(k_x, (B, IC, H, W), jnp.float32)

    fwd = jax.jit(functools.partial(
        gaudi_gblr_conv2d_forward, kernel_size=(KH, KW), stride=stride,
        padding=padding, dilation=dilation))
    out = jax.block_until_ready(fwd(x, params))

    ref = jax.block_until_ready(reference_forward(
        x, params, kernel_size=(KH, KW), stride=stride,
        padding=padding, dilation=dilation))

    assert out.shape == (B, OC, H, W), out.shape
    # bf16 MXU inputs (f32 accumulation) vs f32-HIGHEST reference -> loosened tolerance.
    assert bool(jnp.allclose(out, ref, atol=5e-2, rtol=5e-2)), \
        f"max abs diff {float(jnp.max(jnp.abs(out - ref)))}"
    print("KERNEL_OK")
</pallas_src>

<mosaic_0001>
module attributes {stable_mosaic.version = 11 : i64} {
  func.func @masked_weight_kernel(%arg0: i32, %arg1: memref<128x8xf32, #tpu.memory_space<vmem>>, %arg2: memref<128x8xf32, #tpu.memory_space<vmem>>, %arg3: memref<8x128xf32, #tpu.memory_space<vmem>>, %arg4: memref<8x128xf32, #tpu.memory_space<vmem>>, %arg5: memref<128x128xbf16, #tpu.memory_space<vmem>>) attributes {dimension_semantics = [#tpu.dimension_semantics<arbitrary>], iteration_bounds = array<i64: 1>, scalar_prefetch = 0 : i64, scratch_operands = 0 : i64, tpu.core_type = #tpu.core_type<tc>, window_params = [{pipeline_mode = #tpu.pipeline_mode<synchronous>, transform_indices = @transform_0, window_bounds = array<i64: 128, 8>}, {pipeline_mode = #tpu.pipeline_mode<synchronous>, transform_indices = @transform_1, window_bounds = array<i64: 128, 8>}, {pipeline_mode = #tpu.pipeline_mode<synchronous>, transform_indices = @transform_2, window_bounds = array<i64: 8, 128>}, {pipeline_mode = #tpu.pipeline_mode<synchronous>, transform_indices = @transform_3, window_bounds = array<i64: 8, 128>}, {pipeline_mode = #tpu.pipeline_mode<synchronous>, transform_indices = @transform_4, window_bounds = array<i64: 128, 128>}]} {
    %c0 = arith.constant 0 : index
    %c0_0 = arith.constant 0 : index
    %0 = vector.load %arg1[%c0, %c0_0] : memref<128x8xf32, #tpu.memory_space<vmem>>, vector<128x8xf32>
    %c0_1 = arith.constant 0 : index
    %c0_2 = arith.constant 0 : index
    %1 = vector.load %arg2[%c0_1, %c0_2] : memref<128x8xf32, #tpu.memory_space<vmem>>, vector<128x8xf32>
    %2 = arith.mulf %0, %1 : vector<128x8xf32>
    %c0_3 = arith.constant 0 : index
    %c0_4 = arith.constant 0 : index
    %3 = vector.load %arg3[%c0_3, %c0_4] : memref<8x128xf32, #tpu.memory_space<vmem>>, vector<8x128xf32>
    %c0_5 = arith.constant 0 : index
    %c0_6 = arith.constant 0 : index
    %4 = vector.load %arg4[%c0_5, %c0_6] : memref<8x128xf32, #tpu.memory_space<vmem>>, vector<8x128xf32>
    %5 = arith.mulf %3, %4 : vector<8x128xf32>
    %cst = arith.constant dense<0.000000e+00> : vector<128x128xf32>
    %6 = tpu.matmul %2, %5, %cst {dimension_numbers = #tpu.dot_dimension_numbers<[1], [0], [0], [1], [0, 0, 1, 1], [], []>, precision = #tpu.contract_precision<fp32>} : vector<128x8xf32>, vector<8x128xf32>, vector<128x128xf32> -> vector<128x128xf32>
    %7 = arith.truncf %6 : vector<128x128xf32> to vector<128x128xbf16>
    %c0_7 = arith.constant 0 : index
    %c0_8 = arith.constant 0 : index
    %8 = vector.load %arg5[%c0_7, %c0_8] : memref<128x128xbf16, #tpu.memory_space<vmem>>, vector<128x128xbf16>
    tpu.vector_store %arg5[%c0_7, %c0_8], %7 {strides = array<i32>} : memref<128x128xbf16, #tpu.memory_space<vmem>>, vector<128x128xbf16>,
    return
  }
  func.func @transform_0(%arg0: i32) -> (i32, i32) {
    %c0_i32 = arith.constant 0 : i32
    %c0_i32_0 = arith.constant 0 : i32
    %c0_i32_1 = arith.constant 0 : i32
    return %c0_i32, %c0_i32_0 : i32, i32
  }
  func.func @transform_1(%arg0: i32) -> (i32, i32) {
    %c0_i32 = arith.constant 0 : i32
    %c0_i32_0 = arith.constant 0 : i32
    %c0_i32_1 = arith.constant 0 : i32
    return %c0_i32, %c0_i32_0 : i32, i32
  }
  func.func @transform_2(%arg0: i32) -> (i32, i32) {
    %c0_i32 = arith.constant 0 : i32
    %c0_i32_0 = arith.constant 0 : i32
    %c0_i32_1 = arith.constant 0 : i32
    return %c0_i32, %c0_i32_0 : i32, i32
  }
  func.func @transform_3(%arg0: i32) -> (i32, i32) {
    %c0_i32 = arith.constant 0 : i32
    %c0_i32_0 = arith.constant 0 : i32
    %c0_i32_1 = arith.constant 0 : i32
    return %c0_i32, %c0_i32_0 : i32, i32
  }
  func.func @transform_4(%arg0: i32) -> (i32, i32) {
    %c0_i32 = arith.constant 0 : i32
    %c0_i32_0 = arith.constant 0 : i32
    %c0_i32_1 = arith.constant 0 : i32
    return %c0_i32, %c0_i32_0 : i32, i32
  }
}

module attributes {stable_mosaic.version = 11 : i64} {
  func.func @conv_matmul_kernel(%arg0: i32, %arg1: i32, %arg2: i32, %arg3: memref<512x128xbf16, #tpu.memory_space<vmem>>, %arg4: memref<128x128xbf16, #tpu.memory_space<vmem>>, %arg5: memref<1x128xf32, #tpu.memory_space<vmem>>, %arg6: memref<512x128xf32, #tpu.memory_space<vmem>>, %arg7: memref<512x128xf32, #tpu.memory_space<vmem>>) attributes {dimension_semantics = [#tpu.dimension_semantics<parallel>, #tpu.dimension_semantics<parallel>, #tpu.dimension_semantics<arbitrary>], iteration_bounds = array<i64: 1, 1, 1>, scalar_prefetch = 0 : i64, scratch_operands = 1 : i64, tpu.core_type = #tpu.core_type<tc>, window_params = [{transform_indices = @transform_0, window_bounds = array<i64: 512, 128>}, {transform_indices = @transform_1, window_bounds = array<i64: 128, 128>}, {transform_indices = @transform_2, window_bounds = array<i64: 1, 128>}, {transform_indices = @transform_3, window_bounds = array<i64: 512, 128>}]} {
    %c0_i32 = arith.constant 0 : i32
    %0 = arith.cmpi eq, %arg2, %c0_i32 : i32
    %1 = arith.extui %0 : i1 to i32
    %c0_i32_0 = arith.constant 0 : i32
    %2 = arith.cmpi ne, %1, %c0_i32_0 : i32
    scf.if %2 {
      %cst_10 = arith.constant 0.000000e+00 : f32
      %12 = vector.broadcast %cst_10 : f32 to vector<512x128xf32>
      %c0_11 = arith.constant 0 : index
      %c0_12 = arith.constant 0 : index
      %13 = vector.load %arg7[%c0_11, %c0_12] : memref<512x128xf32, #tpu.memory_space<vmem>>, vector<512x128xf32>
      tpu.vector_store %arg7[%c0_11, %c0_12], %12 {strides = array<i32>} : memref<512x128xf32, #tpu.memory_space<vmem>>, vector<512x128xf32>,
    } else {
    }
    %c0 = arith.constant 0 : index
    %c0_1 = arith.constant 0 : index
    %3 = vector.load %arg7[%c0, %c0_1] : memref<512x128xf32, #tpu.memory_space<vmem>>, vector<512x128xf32>
    %c0_2 = arith.constant 0 : index
    %c0_3 = arith.constant 0 : index
    %4 = vector.load %arg3[%c0_2, %c0_3] : memref<512x128xbf16, #tpu.memory_space<vmem>>, vector<512x128xbf16>
    %c0_4 = arith.constant 0 : index
    %c0_5 = arith.constant 0 : index
    %5 = vector.load %arg4[%c0_4, %c0_5] : memref<128x128xbf16, #tpu.memory_space<vmem>>, vector<128x128xbf16>
    %cst = arith.constant dense<0.000000e+00> : vector<512x128xf32>
    %6 = tpu.matmul %4, %5, %cst {dimension_numbers = #tpu.dot_dimension_numbers<[1], [0], [0], [1], [0, 0, 1, 1], [], []>} : vector<512x128xbf16>, vector<128x128xbf16>, vector<512x128xf32> -> vector<512x128xf32>
    %7 = arith.addf %3, %6 : vector<512x128xf32>
    %c0_6 = arith.constant 0 : index
    %c0_7 = arith.constant 0 : index
    %8 = vector.load %arg7[%c0_6, %c0_7] : memref<512x128xf32, #tpu.memory_space<vmem>>, vector<512x128xf32>
    tpu.vector_store %arg7[%c0_6, %c0_7], %7 {strides = array<i32>} : memref<512x128xf32, #tpu.memory_space<vmem>>, vector<512x128xf32>,
    %c0_i32_8 = arith.constant 0 : i32
    %9 = arith.cmpi eq, %arg2, %c0_i32_8 : i32
    %10 = arith.extui %9 : i1 to i32
    %c0_i32_9 = arith.constant 0 : i32
    %11 = arith.cmpi ne, %10, %c0_i32_9 : i32
    scf.if %11 {
      %c0_10 = arith.constant 0 : index
      %c0_11 = arith.constant 0 : index
      %12 = vector.load %arg7[%c0_10, %c0_11] : memref<512x128xf32, #tpu.memory_space<vmem>>, vector<512x128xf32>
      %c0_12 = arith.constant 0 : index
      %c0_13 = arith.constant 0 : index
      %13 = vector.load %arg5[%c0_12, %c0_13] : memref<1x128xf32, #tpu.memory_space<vmem>>, vector<1x128xf32>
      %14 = vector.broadcast %13 : vector<1x128xf32> to vector<512x128xf32>
      %15 = arith.addf %12, %14 : vector<512x128xf32>
      %c0_14 = arith.constant 0 : index
      %c0_15 = arith.constant 0 : index
      %16 = vector.load %arg6[%c0_14, %c0_15] : memref<512x128xf32, #tpu.memory_space<vmem>>, vector<512x128xf32>
      tpu.vector_store %arg6[%c0_14, %c0_15], %15 {strides = array<i32>} : memref<512x128xf32, #tpu.memory_space<vmem>>, vector<512x128xf32>,
    } else {
    }
    return
  }
  func.func @transform_0(%arg0: i32, %arg1: i32, %arg2: i32) -> (i32, i32) {
    %c0_i32 = arith.constant 0 : i32
    return %arg0, %arg2 : i32, i32
  }
  func.func @transform_1(%arg0: i32, %arg1: i32, %arg2: i32) -> (i32, i32) {
    %c0_i32 = arith.constant 0 : i32
    return %arg2, %arg1 : i32, i32
  }
  func.func @transform_2(%arg0: i32, %arg1: i32, %arg2: i32) -> (i32, i32) {
    %c0_i32 = arith.constant 0 : i32
    %c0_i32_0 = arith.constant 0 : i32
    return %c0_i32, %arg1 : i32, i32
  }
  func.func @transform_3(%arg0: i32, %arg1: i32, %arg2: i32) -> (i32, i32) {
    %c0_i32 = arith.constant 0 : i32
    return %arg0, %arg1 : i32, i32
  }
}

</mosaic_0001>

<bundles_post_ra>
// kernel: reverse.0
= control target key start
LH: loop header
LB: loop body
LE: loop exit
PB: predicated region body
PF: predicated region fallthrough
CT: control target
= control target key end

     0   :  { %v2_v0 = vlaneseq  ;;  %s105_s0 = inlined_call_operand.vmem [shape: f32[4,17], index: 0, kind: input, shape index: {}]   ;;  %s106_s1 = inlined_call_operand.vmem [shape: f32[4,17], index: 1, kind: output, shape index: {}]  }
   0x2   :  { %v3_v1 = vsub.s32 16, %v2_v0 }
   0x4   :  { %4 = vset.pattern.permute.xlu0 %v3_v1 }
   0x5   :  { %v20_v2 = vld [vmem:[%s105_s0] sm:$0xf] }
   0x6   :  { %21 = vst [vmem:[#allocation1] sm:$0xf] %v20_v2 }
   0xd   :  { %v38_v3 = vld [vmem:[#allocation1] sm:$0xf] }
   0xe   :  { %39 = vst [vmem:[#allocation0] sm:$0xf] %v38_v3 }
  0x15   :  { %v40_v4 = vld [vmem:[#allocation0] sm:$0xff] }
  0x16   :  { %41 = vperm.xlu0 %4, %v40_v4  }
  0x95   :  { %v42_v5 = vpop.permute.xlu0 %41 }
  0x96   :  { %43 = vst [vmem:[#allocation2] sm:$0xff] %v42_v5 }
  0x9d   :  { %v47_v6 = vld [vmem:[#allocation2] sm:$0xf] }
  0x9e   :  { %49 = vst [vmem:[#allocation3] sm:$0xf] %v47_v6 }
  0xa5   :  { %v65_v7 = vld [vmem:[#allocation3] sm:$0xf] }
  0xa6   :  { %66 = vst [vmem:[%s106_s1] sm:$0xf] %v65_v7 }

// kernel: reverse.1
= control target key start
LH: loop header
LB: loop body
LE: loop exit
PB: predicated region body
PF: predicated region fallthrough
CT: control target
= control target key end

     0   :  { %v2_v0 = vlaneseq  ;;  %s105_s0 = inlined_call_operand.vmem [shape: f32[4,3], index: 0, kind: input, shape index: {}]   ;;  %s106_s1 = inlined_call_operand.vmem [shape: f32[4,3], index: 1, kind: output, shape index: {}]  }
   0x2   :  { %v3_v1 = vsub.s32 2, %v2_v0 }
   0x4   :  { %4 = vset.pattern.permute.xlu0 %v3_v1 }
   0x5   :  { %v20_v2 = vld [vmem:[%s105_s0] sm:$0xf] }
   0x6   :  { %21 = vst [vmem:[#allocation1] sm:$0xf] %v20_v2 }
   0xd   :  { %v38_v3 = vld [vmem:[#allocation1] sm:$0xf] }
   0xe   :  { %39 = vst [vmem:[#allocation0] sm:$0xf] %v38_v3 }
  0x15   :  { %v40_v4 = vld [vmem:[#allocation0] sm:$0xff] }
  0x16   :  { %41 = vperm.xlu0 %4, %v40_v4  }
  0x95   :  { %v42_v5 = vpop.permute.xlu0 %41 }
  0x96   :  { %43 = vst [vmem:[#allocation2] sm:$0xff] %v42_v5 }
  0x9d   :  { %v47_v6 = vld [vmem:[#allocation2] sm:$0xf] }
  0x9e   :  { %49 = vst [vmem:[#allocation3] sm:$0xf] %v47_v6 }
  0xa5   :  { %v65_v7 = vld [vmem:[#allocation3] sm:$0xf] }
  0xa6   :  { %66 = vst [vmem:[%s106_s1] sm:$0xf] %v65_v7 }

// kernel: gaudi_gblr_conv2d_forward.2
= control target key start
LH: loop header
LB: loop body
LE: loop exit
PB: predicated region body
PF: predicated region fallthrough
CT: control target
= control target key end

     0   :  { %vm68_vm0 = vcmask 64512   ;;  %s2067_s2 = inlined_call_operand.vmem [shape: f32[8,128], index: 2, kind: input, shape index: {}]   ;;  %s2068_s3 = inlined_call_operand.vmem [shape: f32[8,128], index: 3, kind: input, shape index: {}]   ;;  %s2069_s0 = inlined_call_operand.vmem [shape: f32[128,8], index: 0, kind: input, shape index: {}]   ;;  %s2070_s1 = inlined_call_operand.vmem [shape: f32[128,8], index: 1, kind: input, shape index: {}]   ;;  %s2071_s4 = inlined_call_operand.vmem [shape: bf16[128,128], index: 4, kind: output, shape index: {}]  }
   0x1   :  { %v65_v0 = vld [vmem:[%s2067_s2] sm:$0xff]  ;;  %v18_v5 = vld [vmem:[%s2069_s0 + $0x8] sm:$0xff]  ;;  %v19_v9 = vld [vmem:[%s2069_s0 + $0x10] sm:$0xff] }
   0x2   :  { %v66_v1 = vld [vmem:[%s2068_s3] sm:$0xff]  ;;  %v34_v6 = vld [vmem:[%s2070_s1 + $0x8] sm:$0xff]  ;;  %v35_v10 = vld [vmem:[%s2070_s1 + $0x10] sm:$0xff] }
   0x3   :  { %v17_v2 = vld [vmem:[%s2069_s0] sm:$0xff]  ;;  %v67_v3 = vmul.f32 %v66_v1, %v65_v0  ;;  %v50_v8 = vmul.f32 %v34_v6, %v18_v5  ;;  %v20_v11 = vld [vmem:[%s2069_s0 + $0x18] sm:$0xff]  ;;  %v51_v13 = vmul.f32 %v35_v10, %v19_v9  ;;  %v22_v21 = vld [vmem:[%s2069_s0 + $0x28] sm:$0xff] }
   0x4   :  { %v33_v4 = vld [vmem:[%s2070_s1] sm:$0xff]  ;;  %v36_v14 = vld [vmem:[%s2070_s1 + $0x18] sm:$0xff]  ;;  %v38_v22 = vld [vmem:[%s2070_s1 + $0x28] sm:$0xff] }
   0x5   :  { %v49_v7 = vmul.f32 %v33_v4, %v17_v2  ;;  %v1761_v12 = vand.u32 4294901760, %v67_v3  ;;  %v21_v15 = vld [vmem:[%s2069_s0 + $0x20] sm:$0xff]  ;;  %v73_v18 = vsel %vm68_vm0, %v50_v8, 0  ;;  %v52_v19 = vmul.f32 %v36_v14, %v20_v11  ;;  %v23_v27 = vld [vmem:[%s2069_s0 + $0x30] sm:$0xff]  ;;  %v24_v49 = vld [vmem:[%s2069_s0 + $0x38] sm:$0xff] }
   0x6   :  { %v37_v16 = vld [vmem:[%s2070_s1 + $0x20] sm:$0xff]  ;;  %v1783_v24 = vand.u32 4294901760, %v73_v18  ;;  %v76_v26 = vsel %vm68_vm0, %v51_v13, 0  ;;  %v39_v28 = vld [vmem:[%s2070_s1 + $0x30] sm:$0xff]  ;;  %v54_v32 = vmul.f32 %v38_v22, %v22_v21  ;;  %v40_v50 = vld [vmem:[%s2070_s1 + $0x38] sm:$0xff] }
   0x7   :  { %v70_v17 = vsel %vm68_vm0, %v49_v7, 0  ;;  %v53_v20 = vmul.f32 %v37_v16, %v21_v15  ;;  %1551 = vmatprep.subr.mxu0 %v1761_v12  ;;  %1473 = vmatprep.subr.mxu1 %v1761_v12  ;;  %v1787_v25 = vsub.f32 %v67_v3, %v1761_v12  ;;  %v1798_v29 = vand.u32 4294901760, %v76_v26  ;;  %v25_v55 = vld [vmem:[%s2069_s0 + $0x40] sm:$0xff]  ;;  %v26_v61 = vld [vmem:[%s2069_s0 + $0x48] sm:$0xff]  ;;  %v27_v3 = vld [vmem:[%s2069_s0 + $0x50] sm:$0xff] }
   0x8   :  { %v1781_v23 = vand.u32 4294901760, %v70_v17  ;;  %1552 = vmatpush3.msra.mxu0 %v1761_v12  ;;  %1474 = vmatpush3.msra.mxu1 %v1761_v12  ;;  %v79_v30 = vsel %vm68_vm0, %v52_v19, 0  ;;  %v1806_v34 = vsub.f32 %v73_v18, %v1783_v24  ;;  %v85_v39 = vsel %vm68_vm0, %v54_v32, 0  ;;  %v41_v60 = vld [vmem:[%s2070_s1 + $0x40] sm:$0xff]  ;;  %v42_v62 = vld [vmem:[%s2070_s1 + $0x48] sm:$0xff]  ;;  %v43_v8 = vld [vmem:[%s2070_s1 + $0x50] sm:$0xff] }
   0x9   :  { %v82_v31 = vsel %vm68_vm0, %v53_v20, 0  ;;  %v346_v35 = vand.u32 4294901760, %v1787_v25  ;;  %v1809_v36 = vand.u32 4294901760, %v79_v30  ;;  %v1812_v37 = vsub.f32 %v76_v26, %v1798_v29  ;;  %v28_v9 = vld [vmem:[%s2069_s0 + $0x58] sm:$0xff]  ;;  %v29_v20 = vld [vmem:[%s2069_s0 + $0x60] sm:$0xff] }
   0xa   :  { %v1803_v33 = vsub.f32 %v70_v17, %v1781_v23  ;;  %v1814_v38 = vand.u32 4294901760, %v82_v31  ;;  %v55_v40 = vmul.f32 %v39_v28, %v23_v27  ;;  %v195_v42 = vand.u32 4294901760, %v1806_v34  ;;  %v44_v10 = vld [vmem:[%s2070_s1 + $0x58] sm:$0xff]  ;;  %v45_v21 = vld [vmem:[%s2070_s1 + $0x60] sm:$0xff] }
   0xb   :  { %v347_v43 = vsub.f32 %v1787_v25, %v346_v35  ;;  %1577 = vmatprep.subr.mxu0 %v346_v35  ;;  %v1821_v44 = vsub.f32 %v79_v30, %v1809_v36  ;;  %v205_v45 = vand.u32 4294901760, %v1812_v37  ;;  %v1827_v47 = vand.u32 4294901760, %v85_v39 }
   0xc   :  { %v185_v41 = vand.u32 4294901760, %v1803_v33  ;;  %v1825_v46 = vsub.f32 %v82_v31, %v1814_v38  ;;  %v88_v48 = vsel %vm68_vm0, %v55_v40, 0  ;;  %v196_v53 = vsub.f32 %v1806_v34, %v195_v42  ;;  %v46_v40 = vld [vmem:[%s2070_s1 + $0x68] sm:$0xff] }
   0xd   :  { %v348_v52 = vand.u32 4294901760, %v347_v43  ;;  %v215_v54 = vand.u32 4294901760, %v1821_v44  ;;  %v206_v56 = vsub.f32 %v1812_v37, %v205_v45  ;;  %v1845_v58 = vsub.f32 %v85_v39, %v1827_v47  ;;  %v30_v39 = vld [vmem:[%s2069_s0 + $0x68] sm:$0xff] }
   0xe   :  { %1553 = vmatprep.mubr.f32.mxu0 %v185_v41  ;;  %v186_v51 = vsub.f32 %v1803_v33, %v185_v41  ;;  %v225_v57 = vand.u32 4294901760, %v1825_v46  ;;  %v1847_v59 = vand.u32 4294901760, %v88_v48  ;;  %v197_v0 = vand.u32 4294901760, %v196_v53  ;;  %v47_v53 = vld [vmem:[%s2070_s1 + $0x70] sm:$0xff] }
   0xf   :  { %1554 = vmatmul.mubr.f32.vlgmr.msra.gmra.mrb[0].mxu0 %v195_v42  ;;  %1499 = vmatprep.subr.mxu1 %v348_v52  ;;  %v216_v1 = vsub.f32 %v1821_v44, %v215_v54  ;;  %v56_v2 = vmul.f32 %v40_v50, %v24_v49  ;;  %v207_v4 = vand.u32 4294901760, %v206_v56  ;;  %v235_v5 = vand.u32 4294901760, %v1845_v58 }
  0x10   :  { %v187_v63 = vand.u32 4294901760, %v186_v51  ;;  %1556 = vmatprep.mubr.f32.mxu0 %v205_v45  ;;  %1578 = vmatpush3.msra.mxu0 %v346_v35  ;;  %v226_v6 = vsub.f32 %v1825_v46, %v225_v57  ;;  %v1865_v7 = vsub.f32 %v88_v48, %v1847_v59  ;;  %v57_v14 = vmul.f32 %v41_v60, %v25_v55 }
  0x11   :  { %v217_v11 = vand.u32 4294901760, %v216_v1  ;;  %v91_v13 = vsel %vm68_vm0, %v56_v2, 0  ;;  %v58_v15 = vmul.f32 %v42_v62, %v26_v61  ;;  %1603 = vmatprep.subr.mxu0 %v1761_v12  ;;  %v236_v18 = vsub.f32 %v1845_v58, %v235_v5 }
  0x12   :  { %1475 = vmatprep.mubr.f32.mxu1 %v187_v63  ;;  %v227_v16 = vand.u32 4294901760, %v226_v6  ;;  %v245_v17 = vand.u32 4294901760, %v1865_v7  ;;  %v1880_v19 = vand.u32 4294901760, %v91_v13  ;;  %v94_v22 = vsel %vm68_vm0, %v57_v14, 0 }
  0x13   :  { %1476 = vmatmul.mubr.f32.vlgmr.msra.gmra.mrb[0].mxu1 %v197_v0  ;;  %1557 = vmatmul.mubr.f32.gmra.mrb[2].mxu0 %v215_v54  ;;  %v97_v26 = vsel %vm68_vm0, %v58_v15, 0  ;;  %v59_v27 = vmul.f32 %v43_v8, %v27_v3  ;;  %v60_v28 = vmul.f32 %v44_v10, %v28_v9  ;;  %v237_v30 = vand.u32 4294901760, %v236_v18  ;;  %v32_v9 = vld [vmem:[%s2069_s0 + $0x78] sm:$0xff] }
  0x14   :  { %1500 = vmatpush3.msra.mxu1 %v348_v52  ;;  %1478 = vmatprep.mubr.f32.mxu1 %v207_v4  ;;  %v1891_v31 = vsub.f32 %v91_v13, %v1880_v19  ;;  %v246_v32 = vsub.f32 %v1865_v7, %v245_v17  ;;  %v1894_v35 = vand.u32 4294901760, %v94_v22  ;;  %v1903_v41 = vand.u32 4294901760, %v97_v26  ;;  %v31_v52 = vld [vmem:[%s2069_s0 + $0x70] sm:$0xff]  ;;  %v48_v10 = vld [vmem:[%s2070_s1 + $0x78] sm:$0xff] }
  0x15   :  { %1559 = vmatprep.mubr.f32.mxu0 %v225_v57  ;;  %1525 = vmatprep.subr.mxu1 %v1787_v25  ;;  %v100_v42 = vsel %vm68_vm0, %v59_v27, 0  ;;  %v103_v43 = vsel %vm68_vm0, %v60_v28, 0  ;;  %v61_v45 = vmul.f32 %v45_v21, %v29_v20  ;;  %v62_v57 = vmul.f32 %v46_v40, %v30_v39 }
  0x16   :  { %v255_v48 = vand.u32 4294901760, %v1891_v31  ;;  %v247_v49 = vand.u32 4294901760, %v246_v32  ;;  %v1909_v50 = vsub.f32 %v94_v22, %v1894_v35  ;;  %v1911_v51 = vand.u32 4294901760, %v100_v42 }
  0x17   :  { %1479 = vmatmul.mubr.f32.gmra.mrb[2].mxu1 %v217_v11  ;;  %1560 = vmatmul.mubr.f32.gmra.mrb[4].mxu0 %v235_v5  ;;  %v1920_v54 = vsub.f32 %v97_v26, %v1903_v41  ;;  %v1922_v55 = vand.u32 4294901760, %v103_v43  ;;  %v106_v56 = vsel %vm68_vm0, %v61_v45, 0  ;;  %v109_v2 = vsel %vm68_vm0, %v62_v57, 0 }
  0x18   :  { %1481 = vmatprep.mubr.f32.mxu1 %v227_v16  ;;  %1562 = vmatprep.mubr.f32.mxu0 %v245_v17  ;;  %v265_v60 = vand.u32 4294901760, %v1909_v50  ;;  %v256_v61 = vsub.f32 %v1891_v31, %v255_v48  ;;  %v1928_v62 = vsub.f32 %v100_v42, %v1911_v51  ;;  %v1930_v63 = vand.u32 4294901760, %v106_v56 }
  0x19   :  { %v275_v0 = vand.u32 4294901760, %v1920_v54  ;;  %v1934_v1 = vsub.f32 %v103_v43, %v1922_v55  ;;  %v63_v3 = vmul.f32 %v47_v53, %v31_v52  ;;  %v1950_v14 = vand.u32 4294901760, %v109_v2 }
  0x1a   :  { %v257_v4 = vand.u32 4294901760, %v256_v61  ;;  %v266_v5 = vsub.f32 %v1909_v50, %v265_v60  ;;  %v285_v6 = vand.u32 4294901760, %v1928_v62  ;;  %v1940_v8 = vsub.f32 %v106_v56, %v1930_v63 }
  0x1b   :  { %1482 = vmatmul.mubr.f32.gmra.mrb[4].mxu1 %v237_v30  ;;  %1563 = vmatmul.mubr.f32.gmra.mrb[6].mxu0 %v255_v48  ;;  %v276_v11 = vsub.f32 %v1920_v54, %v275_v0  ;;  %v295_v13 = vand.u32 4294901760, %v1934_v1  ;;  %v112_v15 = vsel %vm68_vm0, %v63_v3, 0  ;;  %v1958_v21 = vsub.f32 %v109_v2, %v1950_v14 }
  0x1c   :  { %1484 = vmatprep.mubr.f32.mxu1 %v247_v49  ;;  %1565 = vmatprep.mubr.f32.mxu0 %v265_v60  ;;  %v267_v16 = vand.u32 4294901760, %v266_v5  ;;  %v286_v17 = vsub.f32 %v1928_v62, %v285_v6  ;;  %v305_v18 = vand.u32 4294901760, %v1940_v8  ;;  %v1955_v20 = vand.u32 4294901760, %v112_v15 }
  0x1d   :  { %v64_v22 = vmul.f32 %v48_v10, %v32_v9  ;;  %v277_v26 = vand.u32 4294901760, %v276_v11  ;;  %v296_v27 = vsub.f32 %v1934_v1, %v295_v13  ;;  %v315_v32 = vand.u32 4294901760, %v1958_v21 }
  0x1e   :  { %v1962_v28 = vsub.f32 %v112_v15, %v1955_v20  ;;  %v287_v30 = vand.u32 4294901760, %v286_v17  ;;  %v306_v39 = vsub.f32 %v1940_v8, %v305_v18 }
  0x1f   :  { %1485 = vmatmul.mubr.f32.gmra.mrb[6].mxu1 %v257_v4  ;;  %1566 = vmatmul.mubr.f32.gmra.mrb[8].mxu0 %v275_v0  ;;  %v115_v40 = vsel %vm68_vm0, %v64_v22, 0  ;;  %v297_v45 = vand.u32 4294901760, %v296_v27  ;;  %v316_v48 = vsub.f32 %v1958_v21, %v315_v32 }
  0x20   :  { %1487 = vmatprep.mubr.f32.mxu1 %v267_v16  ;;  %1568 = vmatprep.mubr.f32.mxu0 %v285_v6  ;;  %v325_v42 = vand.u32 4294901760, %v1962_v28  ;;  %v1968_v43 = vand.u32 4294901760, %v115_v40  ;;  %v307_v52 = vand.u32 4294901760, %v306_v39 }
  0x21   :  { %v317_v57 = vand.u32 4294901760, %v316_v48 }
  0x22   :  { %v1972_v49 = vsub.f32 %v115_v40, %v1968_v43  ;;  %v326_v53 = vsub.f32 %v1962_v28, %v325_v42 }
  0x23   :  { %1488 = vmatmul.mubr.f32.gmra.mrb[8].mxu1 %v277_v26  ;;  %1569 = vmatmul.mubr.f32.gmra.mrb[10].mxu0 %v295_v13 }
  0x24   :  { %1490 = vmatprep.mubr.f32.mxu1 %v287_v30  ;;  %1571 = vmatprep.mubr.f32.mxu0 %v305_v18  ;;  %v335_v56 = vand.u32 4294901760, %v1972_v49  ;;  %v327_v61 = vand.u32 4294901760, %v326_v53 }
  0x26   :  { %v336_v60 = vsub.f32 %v1972_v49, %v335_v56 }
  0x27   :  { %1491 = vmatmul.mubr.f32.gmra.mrb[10].mxu1 %v297_v45  ;;  %1572 = vmatmul.mubr.f32.gmra.mrb[12].mxu0 %v315_v32 }
  0x28   :  { %1493 = vmatprep.mubr.f32.mxu1 %v307_v52  ;;  %1574 = vmatprep.mubr.f32.mxu0 %v325_v42  ;;  %v337_v0 = vand.u32 4294901760, %v336_v60 }
  0x2b   :  { %1494 = vmatmul.mubr.f32.gmra.mrb[12].mxu1 %v317_v57  ;;  %1575 = vmatmul.mubr.f32.gmra.mrb[14].mxu0 %v335_v56 }
  0x2c   :  { %1496 = vmatprep.mubr.f32.mxu1 %v327_v61  ;;  %1579 = vmatprep.mubr.f32.mxu0 %v1781_v23 }
  0x2f   :  { %1497 = vmatmul.mubr.f32.gmra.mrb[14].mxu1 %v337_v0  ;;  %1580 = vmatmul.mubr.f32.vlgmr.msra.gmra.mrb[0].mxu0 %v1783_v24 }
  0x30   :  { %1501 = vmatprep.mubr.f32.mxu1 %v1781_v23  ;;  %1582 = vmatprep.mubr.f32.mxu0 %v1798_v29 }
  0x31   :  { %1604 = vmatpush3.msra.mxu0 %v1761_v12 }
  0x33   :  { %1502 = vmatmul.mubr.f32.vlgmr.msra.gmra.mrb[0].mxu1 %v1783_v24  ;;  %1583 = vmatmul.mubr.f32.gmra.mrb[2].mxu0 %v1809_v36 }
  0x34   :  { %1526 = vmatpush3.msra.mxu1 %v1787_v25  ;;  %1504 = vmatprep.mubr.f32.mxu1 %v1798_v29 }
  0x35   :  { %1585 = vmatprep.mubr.f32.mxu0 %v1814_v38 }
  0x37   :  { %1505 = vmatmul.mubr.f32.gmra.mrb[2].mxu1 %v1809_v36  ;;  %1586 = vmatmul.mubr.f32.gmra.mrb[4].mxu0 %v1827_v47 }
  0x38   :  { %1507 = vmatprep.mubr.f32.mxu1 %v1814_v38  ;;  %1588 = vmatprep.mubr.f32.mxu0 %v1847_v59 }
  0x3b   :  { %1508 = vmatmul.mubr.f32.gmra.mrb[4].mxu1 %v1827_v47  ;;  %1589 = vmatmul.mubr.f32.gmra.mrb[6].mxu0 %v1880_v19 }
  0x3c   :  { %1510 = vmatprep.mubr.f32.mxu1 %v1847_v59  ;;  %1591 = vmatprep.mubr.f32.mxu0 %v1894_v35 }
  0x3f   :  { %1511 = vmatmul.mubr.f32.gmra.mrb[6].mxu1 %v1880_v19  ;;  %1592 = vmatmul.mubr.f32.gmra.mrb[8].mxu0 %v1903_v41 }
  0x40   :  { %1513 = vmatprep.mubr.f32.mxu1 %v1894_v35  ;;  %1594 = vmatprep.mubr.f32.mxu0 %v1911_v51 }
  0x43   :  { %1514 = vmatmul.mubr.f32.gmra.mrb[8].mxu1 %v1903_v41  ;;  %1595 = vmatmul.mubr.f32.gmra.mrb[10].mxu0 %v1922_v55 }
  0x44   :  { %1516 = vmatprep.mubr.f32.mxu1 %v1911_v51  ;;  %1597 = vmatprep.mubr.f32.mxu0 %v1930_v63 }
  0x47   :  { %1517 = vmatmul.mubr.f32.gmra.mrb[10].mxu1 %v1922_v55  ;;  %1598 = vmatmul.mubr.f32.gmra.mrb[12].mxu0 %v1950_v14 }
  0x48   :  { %1519 = vmatprep.mubr.f32.mxu1 %v1930_v63  ;;  %1600 = vmatprep.mubr.f32.mxu0 %v1955_v20 }
  0x4b   :  { %1520 = vmatmul.mubr.f32.gmra.mrb[12].mxu1 %v1950_v14  ;;  %1601 = vmatmul.mubr.f32.gmra.mrb[14].mxu0 %v1968_v43 }
  0x4c   :  { %1522 = vmatprep.mubr.f32.mxu1 %v1955_v20  ;;  %1605 = vmatprep.mubr.f32.mxu0 %v1781_v23 }
  0x4f   :  { %1523 = vmatmul.mubr.f32.gmra.mrb[14].mxu1 %v1968_v43  ;;  %1606 = vmatmul.mubr.f32.vlgmr.msra.gmra.mrb[0].mxu0 %v1783_v24 }
  0x50   :  { %1527 = vmatprep.mubr.f32.mxu1 %v1803_v33  ;;  %1608 = vmatprep.mubr.f32.mxu0 %v1798_v29 }
  0x53   :  { %1528 = vmatmul.mubr.f32.vlgmr.msra.gmra.mrb[0].mxu1 %v1806_v34  ;;  %1609 = vmatmul.mubr.f32.gmra.mrb[2].mxu0 %v1809_v36 }
  0x54   :  { %1530 = vmatprep.mubr.f32.mxu1 %v1812_v37  ;;  %1611 = vmatprep.mubr.f32.mxu0 %v1814_v38 }
  0x57   :  { %1531 = vmatmul.mubr.f32.gmra.mrb[2].mxu1 %v1821_v44  ;;  %1612 = vmatmul.mubr.f32.gmra.mrb[4].mxu0 %v1827_v47 }
  0x58   :  { %1533 = vmatprep.mubr.f32.mxu1 %v1825_v46  ;;  %1614 = vmatprep.mubr.f32.mxu0 %v1847_v59 }
  0x5b   :  { %1534 = vmatmul.mubr.f32.gmra.mrb[4].mxu1 %v1845_v58  ;;  %1615 = vmatmul.mubr.f32.gmra.mrb[6].mxu0 %v1880_v19 }
  0x5c   :  { %1536 = vmatprep.mubr.f32.mxu1 %v1865_v7  ;;  %1617 = vmatprep.mubr.f32.mxu0 %v1894_v35 }
  0x5f   :  { %1537 = vmatmul.mubr.f32.gmra.mrb[6].mxu1 %v1891_v31  ;;  %1618 = vmatmul.mubr.f32.gmra.mrb[8].mxu0 %v1903_v41 }
  0x60   :  { %1539 = vmatprep.mubr.f32.mxu1 %v1909_v50  ;;  %1620 = vmatprep.mubr.f32.mxu0 %v1911_v51 }
  0x63   :  { %1540 = vmatmul.mubr.f32.gmra.mrb[8].mxu1 %v1920_v54  ;;  %1621 = vmatmul.mubr.f32.gmra.mrb[10].mxu0 %v1922_v55 }
  0x64   :  { %1542 = vmatprep.mubr.f32.mxu1 %v1928_v62  ;;  %1623 = vmatprep.mubr.f32.mxu0 %v1930_v63 }
  0x67   :  { %1543 = vmatmul.mubr.f32.gmra.mrb[10].mxu1 %v1934_v1  ;;  %1624 = vmatmul.mubr.f32.gmra.mrb[12].mxu0 %v1950_v14 }
  0x68   :  { %1545 = vmatprep.mubr.f32.mxu1 %v1940_v8  ;;  %1626 = vmatprep.mubr.f32.mxu0 %v1955_v20 }
  0x6b   :  { %1546 = vmatmul.mubr.f32.gmra.mrb[12].mxu1 %v1958_v21  ;;  %1627 = vmatmul.mubr.f32.gmra.mrb[14].mxu0 %v1968_v43 }
  0x6c   :  { %1548 = vmatprep.mubr.f32.mxu1 %v1962_v28 }
  0x6f   :  { %1549 = vmatmul.mubr.f32.gmra.mrb[14].mxu1 %v1972_v49 }
 0x122   :  { %v1607_v12 = vpop.f32.mrb[0].mxu0 }
 0x123   :  { %v1114_v23 = vpop.f32.mrb[1].mxu0 }
 0x126   :  { %v1529_v24 = vpop.f32.mrb[0].mxu1  ;;  %v1610_v25 = vpop.f32.mrb[2].mxu0 }
 0x127   :  { %v1629_v29 = vadd.f32 %v1607_v12, %v1529_v24  ;;  %v579_v33 = vpop.f32.mrb[1].mxu1  ;;  %v1126_v34 = vpop.f32.mrb[3].mxu0 }
 0x128   :  { %v1630_v36 = vadd.f32 %v1114_v23, %v579_v33 }
 0x12a   :  { %v1327_v37 = vpack.c.bf16 %v1629_v29, %v1630_v36  ;;  %v1532_v38 = vpop.f32.mrb[2].mxu1  ;;  %v1613_v44 = vpop.f32.mrb[4].mxu0 }
 0x12b   :  { %v1631_v46 = vadd.f32 %v1610_v25, %v1532_v38  ;;  %v593_v47 = vpop.f32.mrb[3].mxu1  ;;  %v1138_v58 = vpop.f32.mrb[5].mxu0 }
 0x12c   :  { %1328 = vst [vmem:[%s2071_s4] sm:$0xff] %v1327_v37   ;;  %v1632_v59 = vadd.f32 %v1126_v34, %v593_v47 }
 0x12e   :  { %v1332_v7 = vpack.c.bf16 %v1631_v46, %v1632_v59  ;;  %v1535_v19 = vpop.f32.mrb[4].mxu1  ;;  %v1616_v31 = vpop.f32.mrb[6].mxu0 }
 0x12f   :  { %v1633_v35 = vadd.f32 %v1613_v44, %v1535_v19  ;;  %v607_v41 = vpop.f32.mrb[5].mxu1  ;;  %v1150_v50 = vpop.f32.mrb[7].mxu0 }
 0x130   :  { %1364 = vst [vmem:[%s2071_s4 + $0x8] sm:$0xff] %v1332_v7   ;;  %v1634_v51 = vadd.f32 %v1138_v58, %v607_v41 }
 0x132   :  { %v1337_v54 = vpack.c.bf16 %v1633_v35, %v1634_v51  ;;  %v1538_v55 = vpop.f32.mrb[6].mxu1  ;;  %v1619_v62 = vpop.f32.mrb[8].mxu0 }
 0x133   :  { %v1635_v63 = vadd.f32 %v1616_v31, %v1538_v55  ;;  %v621_v1 = vpop.f32.mrb[7].mxu1  ;;  %v1162_v2 = vpop.f32.mrb[9].mxu0 }
 0x134   :  { %1365 = vst [vmem:[%s2071_s4 + $0x10] sm:$0xff] %v1337_v54   ;;  %v1636_v3 = vadd.f32 %v1150_v50, %v621_v1 }
 0x136   :  { %v1342_v4 = vpack.c.bf16 %v1635_v63, %v1636_v3  ;;  %v1541_v5 = vpop.f32.mrb[8].mxu1  ;;  %v1622_v6 = vpop.f32.mrb[10].mxu0 }
 0x137   :  { %v1637_v8 = vadd.f32 %v1619_v62, %v1541_v5  ;;  %v635_v9 = vpop.f32.mrb[9].mxu1  ;;  %v1174_v10 = vpop.f32.mrb[11].mxu0 }
 0x138   :  { %1366 = vst [vmem:[%s2071_s4 + $0x18] sm:$0xff] %v1342_v4   ;;  %v1638_v11 = vadd.f32 %v1162_v2, %v635_v9 }
 0x13a   :  { %v1347_v13 = vpack.c.bf16 %v1637_v8, %v1638_v11  ;;  %v1544_v14 = vpop.f32.mrb[10].mxu1  ;;  %v1625_v15 = vpop.f32.mrb[12].mxu0 }
 0x13b   :  { %v1639_v16 = vadd.f32 %v1622_v6, %v1544_v14  ;;  %v649_v17 = vpop.f32.mrb[11].mxu1  ;;  %v1186_v18 = vpop.f32.mrb[13].mxu0 }
 0x13c   :  { %1367 = vst [vmem:[%s2071_s4 + $0x20] sm:$0xff] %v1347_v13   ;;  %v1640_v20 = vadd.f32 %v1174_v10, %v649_v17 }
 0x13e   :  { %v1352_v21 = vpack.c.bf16 %v1639_v16, %v1640_v20  ;;  %v1547_v22 = vpop.f32.mrb[12].mxu1  ;;  %v1628_v26 = vpop.f32.mrb[14].mxu0 }
 0x13f   :  { %v1641_v27 = vadd.f32 %v1625_v15, %v1547_v22  ;;  %v663_v28 = vpop.f32.mrb[13].mxu1  ;;  %v1198_v30 = vpop.f32.mrb[15].mxu0 }
 0x140   :  { %1368 = vst [vmem:[%s2071_s4 + $0x28] sm:$0xff] %v1352_v21   ;;  %v1642_v32 = vadd.f32 %v1186_v18, %v663_v28 }
 0x142   :  { %v1357_v39 = vpack.c.bf16 %v1641_v27, %v1642_v32  ;;  %v1550_v40 = vpop.f32.mrb[14].mxu1 }
 0x143   :  { %v1643_v42 = vadd.f32 %v1628_v26, %v1550_v40  ;;  %v677_v43 = vpop.f32.mrb[15].mxu1 }
 0x144   :  { %1369 = vst [vmem:[%s2071_s4 + $0x30] sm:$0xff] %v1357_v39   ;;  %v1644_v45 = vadd.f32 %v1198_v30, %v677_v43 }
 0x146   :  { %v1362_v48 = vpack.c.bf16 %v1643_v42, %v1644_v45 }
 0x148   :  { %1370 = vst [vmem:[%s2071_s4 + $0x38] sm:$0xff] %v1362_v48  }

// kernel: gaudi_gblr_conv2d_forward.3
= control target key start
LH: loop header
LB: loop body
LE: loop exit
PB: predicated region body
PF: predicated region fallthrough
CT: control target
= control target key end

     0   :  { %s1708_s1 = inlined_call_operand.vmem [shape: bf16[128,128], index: 1, kind: input, shape index: {}]   ;;  %s1709_s0 = inlined_call_operand.vmem [shape: bf16[512,128], index: 0, kind: input, shape index: {}]   ;;  %s1710_s2 = inlined_call_operand.vmem [shape: f32[1,128], index: 2, kind: input, shape index: {}]   ;;  %s1711_s3 = inlined_call_operand.vmem [shape: f32[512,128], index: 3, kind: output, shape index: {}]  }
   0x1   :  { %v1267_v0 = vld [vmem:[%s1708_s1] sm:$0xff]   ;;  %v1268_v1 = vld [vmem:[%s1708_s1 + $0x8] sm:$0xff]   ;;  %v1269_v2 = vld [vmem:[%s1708_s1 + $0x10] sm:$0xff]  }
   0x2   :  { %1171 = vmatprep.subr.bf16.mxu0 %v1267_v0  ;;  %1251 = vmatprep.subr.bf16.mxu1 %v1267_v0  ;;  %v1270_v3 = vld [vmem:[%s1708_s1 + $0x18] sm:$0xff]   ;;  %v1275_v4 = vld [vmem:[%s1709_s0] sm:$0xff]   ;;  %v1272_v7 = vld [vmem:[%s1708_s1 + $0x28] sm:$0xff]  }
   0x3   :  { %1172 = vmatpush3.bf16.msra.mxu0 %v1267_v0  ;;  %1259 = vmatpush3.bf16.msra.mxu1 %v1267_v0  ;;  %v1276_v5 = vld [vmem:[%s1709_s0 + $0x80] sm:$0xff]   ;;  %v1273_v8 = vld [vmem:[%s1708_s1 + $0x30] sm:$0xff]   ;;  %v1274_v9 = vld [vmem:[%s1708_s1 + $0x38] sm:$0xff]  }
   0x4   :  { %1173 = vmatprep.subr.bf16.mxu0 %v1268_v1  ;;  %1252 = vmatprep.subr.bf16.mxu1 %v1268_v1  ;;  %v1271_v6 = vld [vmem:[%s1708_s1 + $0x20] sm:$0xff]   ;;  %v1277_v10 = vld [vmem:[%s1709_s0 + $0x8] sm:$0xff]   ;;  %v1279_v12 = vld [vmem:[%s1709_s0 + $0x10] sm:$0xff]  }
   0x5   :  { %1187 = vmatprep.mubr.bf16.mxu0 %v1275_v4  ;;  %1219 = vmatprep.mubr.bf16.mxu1 %v1276_v5  ;;  %v1278_v11 = vld [vmem:[%s1709_s0 + $0x88] sm:$0xff]   ;;  %v1280_v13 = vld [vmem:[%s1709_s0 + $0x90] sm:$0xff]   ;;  %v1281_v14 = vld [vmem:[%s1709_s0 + $0x18] sm:$0xff]  }
   0x6   :  { %v1282_v15 = vld [vmem:[%s1709_s0 + $0x98] sm:$0xff]   ;;  %v1283_v16 = vld [vmem:[%s1709_s0 + $0x20] sm:$0xff]   ;;  %v1285_v18 = vld [vmem:[%s1709_s0 + $0x28] sm:$0xff]  }
   0x7   :  { %1174 = vmatpush3.bf16.msra.mxu0 %v1268_v1  ;;  %1260 = vmatpush3.bf16.msra.mxu1 %v1268_v1  ;;  %v1284_v17 = vld [vmem:[%s1709_s0 + $0xa0] sm:$0xff]   ;;  %v1286_v19 = vld [vmem:[%s1709_s0 + $0xa8] sm:$0xff]   ;;  %v1287_v20 = vld [vmem:[%s1709_s0 + $0x30] sm:$0xff]  }
   0x8   :  { %1175 = vmatprep.subr.bf16.mxu0 %v1269_v2  ;;  %1253 = vmatprep.subr.bf16.mxu1 %v1269_v2  ;;  %v1288_v21 = vld [vmem:[%s1709_s0 + $0xb0] sm:$0xff]   ;;  %v1289_v22 = vld [vmem:[%s1709_s0 + $0x38] sm:$0xff]   ;;  %v1291_v24 = vld [vmem:[%s1709_s0 + $0x40] sm:$0xff]  }
   0x9   :  { %v1290_v23 = vld [vmem:[%s1709_s0 + $0xb8] sm:$0xff]   ;;  %v1292_v25 = vld [vmem:[%s1709_s0 + $0xc0] sm:$0xff]   ;;  %v1293_v26 = vld [vmem:[%s1709_s0 + $0x48] sm:$0xff]  }
   0xa   :  { %v1294_v27 = vld [vmem:[%s1709_s0 + $0xc8] sm:$0xff]   ;;  %v1295_v28 = vld [vmem:[%s1709_s0 + $0x50] sm:$0xff]   ;;  %v1297_v30 = vld [vmem:[%s1709_s0 + $0x58] sm:$0xff]  }
   0xb   :  { %1176 = vmatpush3.bf16.msra.mxu0 %v1269_v2  ;;  %1261 = vmatpush3.bf16.msra.mxu1 %v1269_v2  ;;  %v1296_v29 = vld [vmem:[%s1709_s0 + $0xd0] sm:$0xff]   ;;  %v1298_v31 = vld [vmem:[%s1709_s0 + $0xd8] sm:$0xff]   ;;  %v1299_v32 = vld [vmem:[%s1709_s0 + $0x60] sm:$0xff]  }
   0xc   :  { %1177 = vmatprep.subr.bf16.mxu0 %v1270_v3  ;;  %1254 = vmatprep.subr.bf16.mxu1 %v1270_v3  ;;  %v1300_v33 = vld [vmem:[%s1709_s0 + $0xe0] sm:$0xff]   ;;  %v1301_v34 = vld [vmem:[%s1709_s0 + $0x68] sm:$0xff]   ;;  %v1303_v36 = vld [vmem:[%s1709_s0 + $0x70] sm:$0xff]  }
   0xd   :  { %v1302_v35 = vld [vmem:[%s1709_s0 + $0xe8] sm:$0xff]   ;;  %v1304_v37 = vld [vmem:[%s1709_s0 + $0xf0] sm:$0xff]   ;;  %v1305_v38 = vld [vmem:[%s1709_s0 + $0x78] sm:$0xff]  }
   0xe   :  { %v1306_v39 = vld [vmem:[%s1709_s0 + $0xf8] sm:$0xff]   ;;  %v1450_v40 = vld [vmem:[%s1710_s2] ss:$0 sm:$0xff] }
   0xf   :  { %1178 = vmatpush3.bf16.msra.mxu0 %v1270_v3  ;;  %1262 = vmatpush3.bf16.msra.mxu1 %v1270_v3 }
  0x10   :  { %1179 = vmatprep.subr.bf16.mxu0 %v1271_v6  ;;  %1255 = vmatprep.subr.bf16.mxu1 %v1271_v6 }
  0x13   :  { %1180 = vmatpush3.bf16.msra.mxu0 %v1271_v6  ;;  %1263 = vmatpush3.bf16.msra.mxu1 %v1271_v6 }
  0x14   :  { %1181 = vmatprep.subr.bf16.mxu0 %v1272_v7  ;;  %1256 = vmatprep.subr.bf16.mxu1 %v1272_v7 }
  0x17   :  { %1182 = vmatpush3.bf16.msra.mxu0 %v1272_v7  ;;  %1264 = vmatpush3.bf16.msra.mxu1 %v1272_v7 }
  0x18   :  { %1183 = vmatprep.subr.bf16.mxu0 %v1273_v8  ;;  %1257 = vmatprep.subr.bf16.mxu1 %v1273_v8 }
  0x1b   :  { %1184 = vmatpush3.bf16.msra.mxu0 %v1273_v8  ;;  %1265 = vmatpush3.bf16.msra.mxu1 %v1273_v8 }
  0x1c   :  { %1185 = vmatprep.subr.bf16.mxu0 %v1274_v9  ;;  %1258 = vmatprep.subr.bf16.mxu1 %v1274_v9 }
  0x1f   :  { %1186 = vmatpush3.bf16.msra.mxu0 %v1274_v9  ;;  %1266 = vmatpush3.bf16.msra.mxu1 %v1274_v9 }
  0x22   :  { %1188 = vmatmul.mubr.bf16.vlgmr.msra.gmra.mrb[0].mxu0 %v1277_v10  ;;  %1220 = vmatmul.mubr.bf16.vlgmr.msra.gmra.mrb[0].mxu1 %v1278_v11 }
  0x23   :  { %1191 = vmatprep.mubr.bf16.mxu0 %v1279_v12  ;;  %1223 = vmatprep.mubr.bf16.mxu1 %v1280_v13 }
  0x2a   :  { %1192 = vmatmul.mubr.bf16.gmra.mrb[4].mxu0 %v1281_v14  ;;  %1224 = vmatmul.mubr.bf16.gmra.mrb[4].mxu1 %v1282_v15 }
  0x2b   :  { %1195 = vmatprep.mubr.bf16.mxu0 %v1283_v16  ;;  %1227 = vmatprep.mubr.bf16.mxu1 %v1284_v17 }
  0x32   :  { %1196 = vmatmul.mubr.bf16.gmra.mrb[8].mxu0 %v1285_v18  ;;  %1228 = vmatmul.mubr.bf16.gmra.mrb[8].mxu1 %v1286_v19 }
  0x33   :  { %1199 = vmatprep.mubr.bf16.mxu0 %v1287_v20  ;;  %1231 = vmatprep.mubr.bf16.mxu1 %v1288_v21 }
  0x3a   :  { %1200 = vmatmul.mubr.bf16.gmra.mrb[12].mxu0 %v1289_v22  ;;  %1232 = vmatmul.mubr.bf16.gmra.mrb[12].mxu1 %v1290_v23 }
  0x3b   :  { %1203 = vmatprep.mubr.bf16.mxu0 %v1291_v24  ;;  %1235 = vmatprep.mubr.bf16.mxu1 %v1292_v25 }
  0x42   :  { %1204 = vmatmul.mubr.bf16.gmra.mrb[16].mxu0 %v1293_v26  ;;  %1236 = vmatmul.mubr.bf16.gmra.mrb[16].mxu1 %v1294_v27 }
  0x43   :  { %1207 = vmatprep.mubr.bf16.mxu0 %v1295_v28  ;;  %1239 = vmatprep.mubr.bf16.mxu1 %v1296_v29 }
  0x4a   :  { %1208 = vmatmul.mubr.bf16.gmra.mrb[20].mxu0 %v1297_v30  ;;  %1240 = vmatmul.mubr.bf16.gmra.mrb[20].mxu1 %v1298_v31 }
  0x4b   :  { %1211 = vmatprep.mubr.bf16.mxu0 %v1299_v32  ;;  %1243 = vmatprep.mubr.bf16.mxu1 %v1300_v33 }
  0x52   :  { %1212 = vmatmul.mubr.bf16.gmra.mrb[24].mxu0 %v1301_v34  ;;  %1244 = vmatmul.mubr.bf16.gmra.mrb[24].mxu1 %v1302_v35 }
  0x53   :  { %1215 = vmatprep.mubr.bf16.mxu0 %v1303_v36  ;;  %1247 = vmatprep.mubr.bf16.mxu1 %v1304_v37 }
  0x5a   :  { %1216 = vmatmul.mubr.bf16.gmra.mrb[28].mxu0 %v1305_v38  ;;  %1248 = vmatmul.mubr.bf16.gmra.mrb[28].mxu1 %v1306_v39 }
  0xf5   :  { %v1189_v41 = vpop.f32.mrb[0].mxu0  ;;  %v1221_v42 = vpop.f32.mrb[0].mxu1 }
  0xf6   :  { %v960_v43 = vadd.f32 %v1189_v41, %v1450_v40  ;;  %v992_v44 = vadd.f32 %v1221_v42, %v1450_v40  ;;  %v501_v45 = vpop.f32.mrb[1].mxu0  ;;  %v629_v46 = vpop.f32.mrb[1].mxu1 }
  0xf7   :  { %v958_v47 = vadd.f32 %v1450_v40, %v501_v45  ;;  %v990_v48 = vadd.f32 %v1450_v40, %v629_v46  ;;  %v1190_v49 = vpop.f32.mrb[2].mxu0  ;;  %v1222_v50 = vpop.f32.mrb[2].mxu1 }
  0xf8   :  { %1024 = vst [vmem:[%s1711_s3 + $0x10] sm:$0xff] %v960_v43  ;;  %1056 = vst [vmem:[%s1711_s3 + $0x110] sm:$0xff] %v992_v44  ;;  %v961_v51 = vadd.f32 %v1190_v49, %v1450_v40  ;;  %v993_v52 = vadd.f32 %v1222_v50, %v1450_v40  ;;  %v504_v53 = vpop.f32.mrb[3].mxu0  ;;  %v632_v54 = vpop.f32.mrb[3].mxu1 }
  0xf9   :  { %1022 = vst [vmem:[%s1711_s3] sm:$0xff] %v958_v47  ;;  %1054 = vst [vmem:[%s1711_s3 + $0x100] sm:$0xff] %v990_v48  ;;  %v959_v55 = vadd.f32 %v1450_v40, %v504_v53  ;;  %v991_v56 = vadd.f32 %v1450_v40, %v632_v54 }
  0xfa   :  { %1025 = vst [vmem:[%s1711_s3 + $0x18] sm:$0xff] %v961_v51  ;;  %1057 = vst [vmem:[%s1711_s3 + $0x118] sm:$0xff] %v993_v52 }
  0xfb   :  { %1023 = vst [vmem:[%s1711_s3 + $0x8] sm:$0xff] %v959_v55  ;;  %1055 = vst [vmem:[%s1711_s3 + $0x108] sm:$0xff] %v991_v56 }
  0xfd   :  { %v1193_v57 = vpop.f32.mrb[4].mxu0  ;;  %v1225_v58 = vpop.f32.mrb[4].mxu1 }
  0xfe   :  { %v964_v59 = vadd.f32 %v1193_v57, %v1450_v40  ;;  %v996_v60 = vadd.f32 %v1225_v58, %v1450_v40  ;;  %v517_v61 = vpop.f32.mrb[5].mxu0  ;;  %v645_v62 = vpop.f32.mrb[5].mxu1 }
  0xff   :  { %v962_v63 = vadd.f32 %v1450_v40, %v517_v61  ;;  %v994_v0 = vadd.f32 %v1450_v40, %v645_v62  ;;  %v1194_v1 = vpop.f32.mrb[6].mxu0  ;;  %v1226_v2 = vpop.f32.mrb[6].mxu1 }
 0x100   :  { %1028 = vst [vmem:[%s1711_s3 + $0x30] sm:$0xff] %v964_v59  ;;  %1060 = vst [vmem:[%s1711_s3 + $0x130] sm:$0xff] %v996_v60  ;;  %v965_v3 = vadd.f32 %v1194_v1, %v1450_v40  ;;  %v997_v4 = vadd.f32 %v1226_v2, %v1450_v40  ;;  %v520_v5 = vpop.f32.mrb[7].mxu0  ;;  %v648_v6 = vpop.f32.mrb[7].mxu1 }
 0x101   :  { %1026 = vst [vmem:[%s1711_s3 + $0x20] sm:$0xff] %v962_v63  ;;  %1058 = vst [vmem:[%s1711_s3 + $0x120] sm:$0xff] %v994_v0  ;;  %v963_v7 = vadd.f32 %v1450_v40, %v520_v5  ;;  %v995_v8 = vadd.f32 %v1450_v40, %v648_v6 }
 0x102   :  { %1029 = vst [vmem:[%s1711_s3 + $0x38] sm:$0xff] %v965_v3  ;;  %1061 = vst [vmem:[%s1711_s3 + $0x138] sm:$0xff] %v997_v4 }
 0x103   :  { %1027 = vst [vmem:[%s1711_s3 + $0x28] sm:$0xff] %v963_v7  ;;  %1059 = vst [vmem:[%s1711_s3 + $0x128] sm:$0xff] %v995_v8 }
 0x105   :  { %v1197_v9 = vpop.f32.mrb[8].mxu0  ;;  %v1229_v10 = vpop.f32.mrb[8].mxu1 }
 0x106   :  { %v968_v11 = vadd.f32 %v1197_v9, %v1450_v40  ;;  %v1000_v12 = vadd.f32 %v1229_v10, %v1450_v40  ;;  %v533_v13 = vpop.f32.mrb[9].mxu0  ;;  %v661_v14 = vpop.f32.mrb[9].mxu1 }
 0x107   :  { %v966_v15 = vadd.f32 %v1450_v40, %v533_v13  ;;  %v998_v16 = vadd.f32 %v1450_v40, %v661_v14  ;;  %v1198_v17 = vpop.f32.mrb[10].mxu0  ;;  %v1230_v18 = vpop.f32.mrb[10].mxu1 }
 0x108   :  { %1032 = vst [vmem:[%s1711_s3 + $0x50] sm:$0xff] %v968_v11  ;;  %1064 = vst [vmem:[%s1711_s3 + $0x150] sm:$0xff] %v1000_v12  ;;  %v969_v19 = vadd.f32 %v1198_v17, %v1450_v40  ;;  %v1001_v20 = vadd.f32 %v1230_v18, %v1450_v40  ;;  %v536_v21 = vpop.f32.mrb[11].mxu0  ;;  %v664_v22 = vpop.f32.mrb[11].mxu1 }
 0x109   :  { %1030 = vst [vmem:[%s1711_s3 + $0x40] sm:$0xff] %v966_v15  ;;  %1062 = vst [vmem:[%s1711_s3 + $0x140] sm:$0xff] %v998_v16  ;;  %v967_v23 = vadd.f32 %v1450_v40, %v536_v21  ;;  %v999_v24 = vadd.f32 %v1450_v40, %v664_v22 }
 0x10a   :  { %1033 = vst [vmem:[%s1711_s3 + $0x58] sm:$0xff] %v969_v19  ;;  %1065 = vst [vmem:[%s1711_s3 + $0x158] sm:$0xff] %v1001_v20 }
 0x10b   :  { %1031 = vst [vmem:[%s1711_s3 + $0x48] sm:$0xff] %v967_v23  ;;  %1063 = vst [vmem:[%s1711_s3 + $0x148] sm:$0xff] %v999_v24 }
 0x10d   :  { %v1201_v25 = vpop.f32.mrb[12].mxu0  ;;  %v1233_v26 = vpop.f32.mrb[12].mxu1 }
 0x10e   :  { %v972_v27 = vadd.f32 %v1201_v25, %v1450_v40  ;;  %v1004_v28 = vadd.f32 %v1233_v26, %v1450_v40  ;;  %v549_v29 = vpop.f32.mrb[13].mxu0  ;;  %v677_v30 = vpop.f32.mrb[13].mxu1 }
 0x10f   :  { %v970_v31 = vadd.f32 %v1450_v40, %v549_v29  ;;  %v1002_v32 = vadd.f32 %v1450_v40, %v677_v30  ;;  %v1202_v33 = vpop.f32.mrb[14].mxu0  ;;  %v1234_v34 = vpop.f32.mrb[14].mxu1 }
 0x110   :  { %1036 = vst [vmem:[%s1711_s3 + $0x70] sm:$0xff] %v972_v27  ;;  %1068 = vst [vmem:[%s1711_s3 + $0x170] sm:$0xff] %v1004_v28  ;;  %v973_v35 = vadd.f32 %v1202_v33, %v1450_v40  ;;  %v1005_v36 = vadd.f32 %v1234_v34, %v1450_v40  ;;  %v552_v37 = vpop.f32.mrb[15].mxu0  ;;  %v680_v38 = vpop.f32.mrb[15].mxu1 }
 0x111   :  { %1034 = vst [vmem:[%s1711_s3 + $0x60] sm:$0xff] %v970_v31  ;;  %1066 = vst [vmem:[%s1711_s3 + $0x160] sm:$0xff] %v1002_v32  ;;  %v971_v39 = vadd.f32 %v1450_v40, %v552_v37  ;;  %v1003_v41 = vadd.f32 %v1450_v40, %v680_v38 }
 0x112   :  { %1037 = vst [vmem:[%s1711_s3 + $0x78] sm:$0xff] %v973_v35  ;;  %1069 = vst [vmem:[%s1711_s3 + $0x178] sm:$0xff] %v1005_v36 }
 0x113   :  { %1035 = vst [vmem:[%s1711_s3 + $0x68] sm:$0xff] %v971_v39  ;;  %1067 = vst [vmem:[%s1711_s3 + $0x168] sm:$0xff] %v1003_v41 }
 0x115   :  { %v1205_v42 = vpop.f32.mrb[16].mxu0  ;;  %v1237_v43 = vpop.f32.mrb[16].mxu1 }
 0x116   :  { %v976_v44 = vadd.f32 %v1205_v42, %v1450_v40  ;;  %v1008_v45 = vadd.f32 %v1237_v43, %v1450_v40  ;;  %v565_v46 = vpop.f32.mrb[17].mxu0  ;;  %v693_v47 = vpop.f32.mrb[17].mxu1 }
 0x117   :  { %v974_v48 = vadd.f32 %v1450_v40, %v565_v46  ;;  %v1006_v49 = vadd.f32 %v1450_v40, %v693_v47  ;;  %v1206_v50 = vpop.f32.mrb[18].mxu0  ;;  %v1238_v51 = vpop.f32.mrb[18].mxu1 }
 0x118   :  { %1040 = vst [vmem:[%s1711_s3 + $0x90] sm:$0xff] %v976_v44  ;;  %1072 = vst [vmem:[%s1711_s3 + $0x190] sm:$0xff] %v1008_v45  ;;  %v977_v52 = vadd.f32 %v1206_v50, %v1450_v40  ;;  %v1009_v53 = vadd.f32 %v1238_v51, %v1450_v40  ;;  %v568_v54 = vpop.f32.mrb[19].mxu0  ;;  %v696_v55 = vpop.f32.mrb[19].mxu1 }
 0x119   :  { %1038 = vst [vmem:[%s1711_s3 + $0x80] sm:$0xff] %v974_v48  ;;  %1070 = vst [vmem:[%s1711_s3 + $0x180] sm:$0xff] %v1006_v49  ;;  %v975_v56 = vadd.f32 %v1450_v40, %v568_v54  ;;  %v1007_v57 = vadd.f32 %v1450_v40, %v696_v55 }
 0x11a   :  { %1041 = vst [vmem:[%s1711_s3 + $0x98] sm:$0xff] %v977_v52  ;;  %1073 = vst [vmem:[%s1711_s3 + $0x198] sm:$0xff] %v1009_v53 }
 0x11b   :  { %1039 = vst [vmem:[%s1711_s3 + $0x88] sm:$0xff] %v975_v56  ;;  %1071 = vst [vmem:[%s1711_s3 + $0x188] sm:$0xff] %v1007_v57 }
 0x11d   :  { %v1209_v58 = vpop.f32.mrb[20].mxu0  ;;  %v1241_v59 = vpop.f32.mrb[20].mxu1 }
 0x11e   :  { %v980_v60 = vadd.f32 %v1209_v58, %v1450_v40  ;;  %v1012_v61 = vadd.f32 %v1241_v59, %v1450_v40  ;;  %v581_v62 = vpop.f32.mrb[21].mxu0  ;;  %v709_v63 = vpop.f32.mrb[21].mxu1 }
 0x11f   :  { %v978_v0 = vadd.f32 %v1450_v40, %v581_v62  ;;  %v1010_v1 = vadd.f32 %v1450_v40, %v709_v63  ;;  %v1210_v2 = vpop.f32.mrb[22].mxu0  ;;  %v1242_v3 = vpop.f32.mrb[22].mxu1 }
 0x120   :  { %1044 = vst [vmem:[%s1711_s3 + $0xb0] sm:$0xff] %v980_v60  ;;  %1076 = vst [vmem:[%s1711_s3 + $0x1b0] sm:$0xff] %v1012_v61  ;;  %v981_v4 = vadd.f32 %v1210_v2, %v1450_v40  ;;  %v1013_v5 = vadd.f32 %v1242_v3, %v1450_v40  ;;  %v584_v6 = vpop.f32.mrb[23].mxu0  ;;  %v712_v7 = vpop.f32.mrb[23].mxu1 }
 0x121   :  { %1042 = vst [vmem:[%s1711_s3 + $0xa0] sm:$0xff] %v978_v0  ;;  %1074 = vst [vmem:[%s1711_s3 + $0x1a0] sm:$0xff] %v1010_v1  ;;  %v979_v8 = vadd.f32 %v1450_v40, %v584_v6  ;;  %v1011_v9 = vadd.f32 %v1450_v40, %v712_v7 }
 0x122   :  { %1045 = vst [vmem:[%s1711_s3 + $0xb8] sm:$0xff] %v981_v4  ;;  %1077 = vst [vmem:[%s1711_s3 + $0x1b8] sm:$0xff] %v1013_v5 }
 0x123   :  { %1043 = vst [vmem:[%s1711_s3 + $0xa8] sm:$0xff] %v979_v8  ;;  %1075 = vst [vmem:[%s1711_s3 + $0x1a8] sm:$0xff] %v1011_v9 }
 0x125   :  { %v1213_v10 = vpop.f32.mrb[24].mxu0  ;;  %v1245_v11 = vpop.f32.mrb[24].mxu1 }
 0x126   :  { %v984_v12 = vadd.f32 %v1213_v10, %v1450_v40  ;;  %v1016_v13 = vadd.f32 %v1245_v11, %v1450_v40  ;;  %v597_v14 = vpop.f32.mrb[25].mxu0  ;;  %v725_v15 = vpop.f32.mrb[25].mxu1 }
 0x127   :  { %v982_v16 = vadd.f32 %v1450_v40, %v597_v14  ;;  %v1014_v17 = vadd.f32 %v1450_v40, %v725_v15  ;;  %v1214_v18 = vpop.f32.mrb[26].mxu0  ;;  %v1246_v19 = vpop.f32.mrb[26].mxu1 }
 0x128   :  { %1048 = vst [vmem:[%s1711_s3 + $0xd0] sm:$0xff] %v984_v12  ;;  %1080 = vst [vmem:[%s1711_s3 + $0x1d0] sm:$0xff] %v1016_v13  ;;  %v985_v20 = vadd.f32 %v1214_v18, %v1450_v40  ;;  %v1017_v21 = vadd.f32 %v1246_v19, %v1450_v40  ;;  %v600_v22 = vpop.f32.mrb[27].mxu0  ;;  %v728_v23 = vpop.f32.mrb[27].mxu1 }
 0x129   :  { %1046 = vst [vmem:[%s1711_s3 + $0xc0] sm:$0xff] %v982_v16  ;;  %1078 = vst [vmem:[%s1711_s3 + $0x1c0] sm:$0xff] %v1014_v17  ;;  %v983_v24 = vadd.f32 %v1450_v40, %v600_v22  ;;  %v1015_v25 = vadd.f32 %v1450_v40, %v728_v23 }
 0x12a   :  { %1049 = vst [vmem:[%s1711_s3 + $0xd8] sm:$0xff] %v985_v20  ;;  %1081 = vst [vmem:[%s1711_s3 + $0x1d8] sm:$0xff] %v1017_v21 }
 0x12b   :  { %1047 = vst [vmem:[%s1711_s3 + $0xc8] sm:$0xff] %v983_v24  ;;  %1079 = vst [vmem:[%s1711_s3 + $0x1c8] sm:$0xff] %v1015_v25 }
 0x12d   :  { %v1217_v26 = vpop.f32.mrb[28].mxu0  ;;  %v1249_v27 = vpop.f32.mrb[28].mxu1 }
 0x12e   :  { %v988_v28 = vadd.f32 %v1217_v26, %v1450_v40  ;;  %v1020_v29 = vadd.f32 %v1249_v27, %v1450_v40  ;;  %v613_v30 = vpop.f32.mrb[29].mxu0  ;;  %v741_v31 = vpop.f32.mrb[29].mxu1 }
 0x12f   :  { %v986_v32 = vadd.f32 %v1450_v40, %v613_v30  ;;  %v1018_v33 = vadd.f32 %v1450_v40, %v741_v31  ;;  %v1218_v34 = vpop.f32.mrb[30].mxu0  ;;  %v1250_v35 = vpop.f32.mrb[30].mxu1 }
 0x130   :  { %1052 = vst [vmem:[%s1711_s3 + $0xf0] sm:$0xff] %v988_v28  ;;  %1084 = vst [vmem:[%s1711_s3 + $0x1f0] sm:$0xff] %v1020_v29  ;;  %v989_v36 = vadd.f32 %v1218_v34, %v1450_v40  ;;  %v1021_v37 = vadd.f32 %v1250_v35, %v1450_v40  ;;  %v616_v38 = vpop.f32.mrb[31].mxu0  ;;  %v744_v39 = vpop.f32.mrb[31].mxu1 }
 0x131   :  { %1050 = vst [vmem:[%s1711_s3 + $0xe0] sm:$0xff] %v986_v32  ;;  %1082 = vst [vmem:[%s1711_s3 + $0x1e0] sm:$0xff] %v1018_v33  ;;  %v987_v41 = vadd.f32 %v1450_v40, %v616_v38  ;;  %v1019_v42 = vadd.f32 %v1450_v40, %v744_v39 }
 0x132   :  { %1053 = vst [vmem:[%s1711_s3 + $0xf8] sm:$0xff] %v989_v36  ;;  %1085 = vst [vmem:[%s1711_s3 + $0x1f8] sm:$0xff] %v1021_v37 }
 0x133   :  { %1051 = vst [vmem:[%s1711_s3 + $0xe8] sm:$0xff] %v987_v41  ;;  %1083 = vst [vmem:[%s1711_s3 + $0x1e8] sm:$0xff] %v1019_v42 }

</bundles_post_ra>
